<compile_context>
chip_gen: v5e
topology: v5e:2x2
jax: 0.10.0
libtpu: 0.0.40
codegen_flags: <defaults>
</compile_context>

<pallas_src>
import functools

import jax
import jax.numpy as jnp
from jax import lax
from jax.experimental import pallas as pl
from jax.experimental.pallas import tpu as pltpu


def _round_up(v, m):
    return ((v + m - 1) // m) * m


def _rbf_kernel(x_ref, x1_ref, x1_sq_ref, o_ref, *, neg_inv_h, two_over_h):
    # x_ref    : (tile_n, D)   tile of x rows
    # x1_ref   : (tile_m, D)   tile of x1 rows
    # x1_sq_ref: (1, tile_m)   precomputed  -||x1_j||^2 / h  (hoisted to wrapper)
    # o_ref    : (tile_n, tile_m) output tile
    x = x_ref[...].astype(jnp.float32)
    x1 = x1_ref[...].astype(jnp.float32)

    # Row norms of the x tile, already scaled by -1/h (tiny (tn, 1) VPU op).
    x_sq = jnp.sum(x * x, axis=-1, keepdims=True) * neg_inv_h          # (tn, 1)

    # NT matmul on the MXU: cross[i, j] = <x_i, x1_j>  (no explicit transpose).
    cross = lax.dot_general(
        x, x1,
        dimension_numbers=(((1,), (1,)), ((), ())),
        preferred_element_type=jnp.float32)                            # (tn, tm)

    # arg = -(||x||^2 + ||x1||^2 - 2<x, x1>) / h
    arg = x_sq + x1_sq_ref[...] + cross * two_over_h                   # (tn, tm)
    # d >= 0  <=>  arg <= 0 (h > 0): clamp fp-cancellation artifacts.
    arg = jnp.minimum(arg, 0.0)
    o_ref[...] = jnp.exp(arg).astype(o_ref.dtype)                      # EUP exp


def rbf_forward(x, x1=None, h=1.0, *, tile_n=256, tile_m=512,
                out_dtype=jnp.float32):
    """RBFKernel.forward equivalent.

    x : (N, D), x1 : (M, D) -> (N, M).  If x1 is None, returns 1 (as in PyTorch).
    """
    if x1 is None:
        return 1

    N, D = x.shape
    M, D1 = x1.shape
    assert D == D1, "feature dims must match"
    assert h > 0, "bandwidth must be positive"

    # Mean-center both inputs with a shared vector (distance-preserving) to
    # reduce cancellation in the norm-expansion formula.
    x = x.astype(jnp.float32)
    x1 = x1.astype(jnp.float32)
    mu = 0.5 * (jnp.mean(x, axis=0) + jnp.mean(x1, axis=0))
    x = x - mu
    x1 = x1 - mu

    # Hardware-friendly, lane-dense tiles: tile_n multiple of 8 (sublane),
    # tile_m multiple of 128 (lane). Clamp to the padded problem size.
    tile_n = max(8, min(tile_n, _round_up(N, 8)))
    tile_m = max(128, min(tile_m, _round_up(M, 128)))
    n_pad = _round_up(N, tile_n)
    m_pad = _round_up(M, tile_m)

    if n_pad != N:
        x = jnp.pad(x, ((0, n_pad - N), (0, 0)))
    if m_pad != M:
        x1 = jnp.pad(x1, ((0, m_pad - M), (0, 0)))

    neg_inv_h = -1.0 / float(h)
    two_over_h = 2.0 / float(h)

    # Hoisted x1 row norms, pre-scaled by -1/h, already laid out as (1, M_pad).
    x1_sq_scaled = (jnp.sum(x1 * x1, axis=-1) * neg_inv_h)[None, :]

    grid = (n_pad // tile_n, m_pad // tile_m)
    kernel = functools.partial(_rbf_kernel,
                               neg_inv_h=neg_inv_h,
                               two_over_h=two_over_h)

    out = pl.pallas_call(
        kernel,
        out_shape=jax.ShapeDtypeStruct((n_pad, m_pad), out_dtype),
        grid_spec=pltpu.PrefetchScalarGridSpec(
            num_scalar_prefetch=0,
            grid=grid,
            in_specs=[
                # tile of x rows (D is the full feature dim -> lane axis)
                pl.BlockSpec((tile_n, D), lambda i, j: (i, 0)),
                # tile of x1 rows
                pl.BlockSpec((tile_m, D), lambda i, j: (j, 0)),
                # matching slice of precomputed -||x1||^2 / h
                pl.BlockSpec((1, tile_m), lambda i, j: (0, j)),
            ],
            out_specs=pl.BlockSpec((tile_n, tile_m), lambda i, j: (i, j)),
        ),
        compiler_params=pltpu.CompilerParams(
            dimension_semantics=("parallel", "parallel"),
            vmem_limit_bytes=32 * 1024 * 1024,
        ),
    )(x, x1, x1_sq_scaled)

    if n_pad != N or m_pad != M:
        out = out[:N, :M]
    return out


def rbf_reference(x, x1, h=1.0):
    # Pure-JAX reference matching the PyTorch broadcast form exactly.
    diff = x[..., :, None, :] - x1[..., None, :, :]
    d = jnp.sum(diff * diff, axis=-1)
    return jnp.exp(-d / h)


if __name__ == "__main__":
    key = jax.random.PRNGKey(0)
    k1, k2 = jax.random.split(key)

    N, M, D = 128, 128, 32   # small shapes consistent with the module
    h = 1.0

    x = jax.random.normal(k1, (N, D), dtype=jnp.float32)
    x1 = jax.random.normal(k2, (M, D), dtype=jnp.float32)

    out = rbf_forward(x, x1, h=h)
    out = jax.block_until_ready(out)

    ref = rbf_reference(x, x1, h=h)
    assert out.shape == (N, M)
    assert jnp.allclose(out, ref, atol=1e-5, rtol=1e-5), "mismatch vs reference"

    # Non-multiple-of-tile shapes exercise the padding path.
    xo = jax.random.normal(k1, (100, D), dtype=jnp.float32)
    x1o = jax.random.normal(k2, (200, D), dtype=jnp.float32)
    out_odd = jax.block_until_ready(rbf_forward(xo, x1o, h=0.5))
    ref_odd = rbf_reference(xo, x1o, h=0.5)
    assert out_odd.shape == (100, 200)
    assert jnp.allclose(out_odd, ref_odd, atol=1e-5, rtol=1e-5), "mismatch (padded)"

    # x1 is None branch (returns the scalar 1, as in PyTorch)
    assert rbf_forward(x, None, h=h) == 1

    # TODO(synk): optional bf16-output variant (out_dtype=jnp.bfloat16) halves
    # HBM store traffic for the writeback-bound small-D case; not enabled by
    # default since it changes numerics vs. the f32 PyTorch reference.
    print("KERNEL_OK")
</pallas_src>

<mosaic_0001>
module attributes {stable_mosaic.version = 11 : i64} {
  func.func @_rbf_kernel(%arg0: i32, %arg1: i32, %arg2: memref<128x32xf32, #tpu.memory_space<vmem>>, %arg3: memref<128x32xf32, #tpu.memory_space<vmem>>, %arg4: memref<1x128xf32, #tpu.memory_space<vmem>>, %arg5: memref<128x128xf32, #tpu.memory_space<vmem>>) attributes {dimension_semantics = [#tpu.dimension_semantics<parallel>, #tpu.dimension_semantics<parallel>], iteration_bounds = array<i64: 1, 1>, scalar_prefetch = 0 : i64, scratch_operands = 0 : i64, tpu.core_type = #tpu.core_type<tc>, window_params = [{transform_indices = @transform_0, window_bounds = array<i64: 128, 32>}, {transform_indices = @transform_1, window_bounds = array<i64: 128, 32>}, {transform_indices = @transform_2, window_bounds = array<i64: 1, 128>}, {transform_indices = @transform_3, window_bounds = array<i64: 128, 128>}]} {
    %c0 = arith.constant 0 : index
    %c0_0 = arith.constant 0 : index
    %0 = vector.load %arg2[%c0, %c0_0] : memref<128x32xf32, #tpu.memory_space<vmem>>, vector<128x32xf32>
    %c0_1 = arith.constant 0 : index
    %c0_2 = arith.constant 0 : index
    %1 = vector.load %arg3[%c0_1, %c0_2] : memref<128x32xf32, #tpu.memory_space<vmem>>, vector<128x32xf32>
    %2 = arith.mulf %0, %0 : vector<128x32xf32>
    %cst = arith.constant dense<0.000000e+00> : vector<128xf32>
    %3 = vector.multi_reduction <add>, %2, %cst [1] : vector<128x32xf32> to vector<128xf32>
    %4 = vector.shape_cast %3 : vector<128xf32> to vector<128x1xf32>
    %cst_3 = arith.constant -1.000000e+00 : f32
    %5 = vector.broadcast %cst_3 : f32 to vector<128x1xf32>
    %6 = arith.mulf %4, %5 : vector<128x1xf32>
    %cst_4 = arith.constant dense<0.000000e+00> : vector<128x128xf32>
    %7 = tpu.matmul %0, %1, %cst_4 {dimension_numbers = #tpu.dot_dimension_numbers<[1], [1], [0], [0], [0, 0, 1, 0], [], []>} : vector<128x32xf32>, vector<128x32xf32>, vector<128x128xf32> -> vector<128x128xf32>
    %c0_5 = arith.constant 0 : index
    %c0_6 = arith.constant 0 : index
    %8 = vector.load %arg4[%c0_5, %c0_6] : memref<1x128xf32, #tpu.memory_space<vmem>>, vector<1x128xf32>
    %9 = vector.broadcast %6 : vector<128x1xf32> to vector<128x128xf32>
    %10 = vector.broadcast %8 : vector<1x128xf32> to vector<128x128xf32>
    %11 = arith.addf %9, %10 : vector<128x128xf32>
    %cst_7 = arith.constant 2.000000e+00 : f32
    %12 = vector.broadcast %cst_7 : f32 to vector<128x128xf32>
    %13 = arith.mulf %7, %12 : vector<128x128xf32>
    %14 = arith.addf %11, %13 : vector<128x128xf32>
    %cst_8 = arith.constant 0.000000e+00 : f32
    %15 = vector.broadcast %cst_8 : f32 to vector<128x128xf32>
    %16 = arith.minimumf %14, %15 : vector<128x128xf32>
    %17 = math.exp %16 : vector<128x128xf32>
    %c0_9 = arith.constant 0 : index
    %c0_10 = arith.constant 0 : index
    %18 = vector.load %arg5[%c0_9, %c0_10] : memref<128x128xf32, #tpu.memory_space<vmem>>, vector<128x128xf32>
    tpu.vector_store %arg5[%c0_9, %c0_10], %17 {strides = array<i32>} : memref<128x128xf32, #tpu.memory_space<vmem>>, vector<128x128xf32>,
    return
  }
  func.func @transform_0(%arg0: i32, %arg1: i32) -> (i32, i32) {
    %c0_i32 = arith.constant 0 : i32
    %c0_i32_0 = arith.constant 0 : i32
    return %arg0, %c0_i32 : i32, i32
  }
  func.func @transform_1(%arg0: i32, %arg1: i32) -> (i32, i32) {
    %c0_i32 = arith.constant 0 : i32
    %c0_i32_0 = arith.constant 0 : i32
    return %arg1, %c0_i32 : i32, i32
  }
  func.func @transform_2(%arg0: i32, %arg1: i32) -> (i32, i32) {
    %c0_i32 = arith.constant 0 : i32
    %c0_i32_0 = arith.constant 0 : i32
    return %c0_i32, %arg1 : i32, i32
  }
  func.func @transform_3(%arg0: i32, %arg1: i32) -> (i32, i32) {
    %c0_i32 = arith.constant 0 : i32
    return %arg0, %arg1 : i32, i32
  }
}

</mosaic_0001>

<bundles_post_ra>
// kernel: tpu_custom_call.1
= control target key start
LH: loop header
LB: loop body
LE: loop exit
PB: predicated region body
PF: predicated region fallthrough
CT: control target
= control target key end

     0   :  { %vm63_vm0 = vcmask 261120   ;;  %s861_s0 = inlined_call_operand.vmem [shape: f32[128,32], index: 0, kind: input, shape index: {}]   ;;  %s862_s1 = inlined_call_operand.vmem [shape: f32[128,32], index: 1, kind: input, shape index: {}]   ;;  %s863_s2 = inlined_call_operand.vmem [shape: f32[1,128], index: 2, kind: input, shape index: {}]   ;;  %s864_s3 = inlined_call_operand.hbm [shape: f32[128,128], index: 3, kind: output, shape index: {}]  }
   0x1   :  { %v46_v0 = vld [vmem:[%s862_s1 + $0x78] sm:$0xff]  ;;  %v45_v1 = vld [vmem:[%s862_s1 + $0x70] sm:$0xff] }
   0x2   :  { %423 = vmatpush.xpose.msk.msra.mxu0 %vm63_vm0, %v46_v0  ;;  %455 = vmatpush.xpose.msk.msra.mxu1 %vm63_vm0, %v46_v0 }
   0x3   :  { %456 = vmatpush.xpose.msk.msra.mxu2 %vm63_vm0, %v46_v0  ;;  %457 = vmatpush.xpose.msk.msra.mxu3 %vm63_vm0, %v46_v0 }
   0x4   :  { %8 = vsyncpa [#allocation3], 0  ;;  %v44_v2 = vld [vmem:[%s862_s1 + $0x68] sm:$0xff]  ;;  %v43_v3 = vld [vmem:[%s862_s1 + $0x60] sm:$0xff]  ;;  %s411_s25 = sshll.u32 %s864_s3, 4  ;;  %s566_s26 = smov 128   ;;  %s412_s25 = int_to_ptr.hbm [resolvable:$true] %s411_s25 }
   0x5   :  { %v615_v4 = vld [vmem:[%s861_s0] sm:$0xff]  ;;  %v42_v6 = vld [vmem:[%s862_s1 + $0x58] sm:$0xff]  ;;  %v41_v8 = vld [vmem:[%s862_s1 + $0x50] sm:$0xff]  ;;  %s567_s27 = smov 8  }
   0x6   :  { %424 = vmatpush.xpose.msk.msra.mxu0 %vm63_vm0, %v45_v1  ;;  %458 = vmatpush.xpose.msk.msra.mxu1 %vm63_vm0, %v45_v1  ;;  %v47_v5 = vmul.f32 %v615_v4, %v615_v4  ;;  %v637_v9 = vld [vmem:[%s861_s0 + $0x10] sm:$0xff]  ;;  %v642_v10 = vld [vmem:[%s861_s0 + $0x8] sm:$0xff]  ;;  %v39_v16 = vld [vmem:[%s862_s1 + $0x40] sm:$0xff] }
   0x7   :  { %459 = vmatpush.xpose.msk.msra.mxu2 %vm63_vm0, %v45_v1  ;;  %460 = vmatpush.xpose.msk.msra.mxu3 %vm63_vm0, %v45_v1  ;;  %v49_v11 = vmul.f32 %v637_v9, %v637_v9  ;;  %v48_v12 = vmul.f32 %v642_v10, %v642_v10  ;;  %v40_v13 = vld [vmem:[%s862_s1 + $0x48] sm:$0xff]  ;;  %v667_v17 = vld [vmem:[%s861_s0 + $0x20] sm:$0xff]  ;;  %v672_v18 = vld [vmem:[%s861_s0 + $0x18] sm:$0xff] }
   0x8   :  { %v64_v7 = vsel %vm63_vm0, %v47_v5, 0.0  ;;  %v677_v19 = vld [vmem:[%s861_s0 + $0x30] sm:$0xff]  ;;  %v51_v20 = vmul.f32 %v667_v17, %v667_v17  ;;  %v50_v21 = vmul.f32 %v672_v18, %v672_v18  ;;  %v38_v23 = vld [vmem:[%s862_s1 + $0x38] sm:$0xff]  ;;  %v700_v27 = vld [vmem:[%s861_s0 + $0x28] sm:$0xff] }
   0x9   :  { %65 = vadd.xlane.f32.xlu0 %v64_v7  ;;  %v70_v14 = vsel %vm63_vm0, %v49_v11, 0.0  ;;  %v67_v15 = vsel %vm63_vm0, %v48_v12, 0.0  ;;  %v53_v22 = vmul.f32 %v677_v19, %v677_v19  ;;  %v705_v28 = vld [vmem:[%s861_s0 + $0x38] sm:$0xff]  ;;  %v710_v29 = vld [vmem:[%s861_s0 + $0x48] sm:$0xff]  ;;  %v37_v30 = vld [vmem:[%s862_s1 + $0x30] sm:$0xff]  ;;  %v52_v31 = vmul.f32 %v700_v27, %v700_v27 }
   0xa   :  { %425 = vmatpush.xpose.msk.msra.mxu0 %vm63_vm0, %v44_v2  ;;  %461 = vmatpush.xpose.msk.msra.mxu1 %vm63_vm0, %v44_v2  ;;  %v76_v24 = vsel %vm63_vm0, %v51_v20, 0.0  ;;  %v73_v25 = vsel %vm63_vm0, %v50_v21, 0.0  ;;  %v54_v32 = vmul.f32 %v705_v28, %v705_v28  ;;  %v56_v33 = vmul.f32 %v710_v29, %v710_v29  ;;  %v36_v37 = vld [vmem:[%s862_s1 + $0x28] sm:$0xff]  ;;  %v23_v38 = vld [vmem:[%s861_s0 + $0x40] sm:$0xff]  ;;  %v25_v41 = vld [vmem:[%s861_s0 + $0x50] sm:$0xff] }
   0xb   :  { %462 = vmatpush.xpose.msk.msra.mxu2 %vm63_vm0, %v44_v2  ;;  %463 = vmatpush.xpose.msk.msra.mxu3 %vm63_vm0, %v44_v2  ;;  %v82_v26 = vsel %vm63_vm0, %v53_v22, 0.0  ;;  %v79_v34 = vsel %vm63_vm0, %v52_v31, 0.0  ;;  %v27_v39 = vld [vmem:[%s861_s0 + $0x60] sm:$0xff]  ;;  %v55_v40 = vmul.f32 %v23_v38, %v23_v38  ;;  %v57_v44 = vmul.f32 %v25_v41, %v25_v41  ;;  %v34_v48 = vld [vmem:[%s862_s1 + $0x18] sm:$0xff]  ;;  %v28_v49 = vld [vmem:[%s861_s0 + $0x68] sm:$0xff] }
   0xc   :  { %71 = vadd.xlane.f32.xlu1 %v70_v14  ;;  %77 = vadd.xlane.f32.xlu2 %v76_v24  ;;  %v85_v35 = vsel %vm63_vm0, %v54_v32, 0.0  ;;  %v91_v36 = vsel %vm63_vm0, %v56_v33, 0.0  ;;  %v59_v42 = vmul.f32 %v27_v39, %v27_v39  ;;  %v35_v43 = vld [vmem:[%s862_s1 + $0x20] sm:$0xff]  ;;  %v26_v50 = vld [vmem:[%s861_s0 + $0x58] sm:$0xff]  ;;  %v60_v51 = vmul.f32 %v28_v49, %v28_v49  ;;  %v33_v52 = vld [vmem:[%s862_s1 + $0x10] sm:$0xff] }
   0xd   :  { %v88_v45 = vsel %vm63_vm0, %v55_v40, 0.0  ;;  %v94_v46 = vsel %vm63_vm0, %v57_v44, 0.0  ;;  %v58_v53 = vmul.f32 %v26_v50, %v26_v50  ;;  %v32_v56 = vld [vmem:[%s862_s1 + $0x8] sm:$0xff]  ;;  %v29_v57 = vld [vmem:[%s861_s0 + $0x70] sm:$0xff]  ;;  %v30_v58 = vld [vmem:[%s861_s0 + $0x78] sm:$0xff] }
   0xe   :  { %426 = vmatpush.xpose.msk.msra.mxu0 %vm63_vm0, %v43_v3  ;;  %464 = vmatpush.xpose.msk.msra.mxu1 %vm63_vm0, %v43_v3  ;;  %v100_v47 = vsel %vm63_vm0, %v59_v42, 0.0  ;;  %v103_v55 = vsel %vm63_vm0, %v60_v51, 0.0  ;;  %v61_v59 = vmul.f32 %v29_v57, %v29_v57  ;;  %v62_v60 = vmul.f32 %v30_v58, %v30_v58  ;;  %v31_v61 = vld [vmem:[%s862_s1] sm:$0xff] }
   0xf   :  { %465 = vmatpush.xpose.msk.msra.mxu2 %vm63_vm0, %v43_v3  ;;  %466 = vmatpush.xpose.msk.msra.mxu3 %vm63_vm0, %v43_v3  ;;  %v97_v54 = vsel %vm63_vm0, %v58_v53, 0.0  ;;  %v834_v11 = vld [vmem:[%s863_s2] ss:$0 sm:$0xff]  ;;  %s565_s2 = smov [#allocation2]  }
  0x10   :  { %v109_v62 = vsel %vm63_vm0, %v62_v60, 0.0  ;;  %v106_v63 = vsel %vm63_vm0, %v61_v59, 0.0  ;;  %s409_s22 = sshll.u32 %s565_s2, 4  ;;  %s410_s22 = int_to_ptr.vmem [resolvable:$true] %s409_s22 }
  0x11   :  { %68 = vadd.xlane.f32.xlu0 %v67_v15 }
  0x12   :  { %427 = vmatpush.xpose.msk.msra.mxu0 %vm63_vm0, %v42_v6  ;;  %467 = vmatpush.xpose.msk.msra.mxu1 %vm63_vm0, %v42_v6 }
  0x13   :  { %468 = vmatpush.xpose.msk.msra.mxu2 %vm63_vm0, %v42_v6  ;;  %469 = vmatpush.xpose.msk.msra.mxu3 %vm63_vm0, %v42_v6 }
  0x14   :  { %74 = vadd.xlane.f32.xlu1 %v73_v25  ;;  %80 = vadd.xlane.f32.xlu2 %v79_v34 }
  0x16   :  { %428 = vmatpush.xpose.msk.msra.mxu0 %vm63_vm0, %v41_v8  ;;  %470 = vmatpush.xpose.msk.msra.mxu1 %vm63_vm0, %v41_v8 }
  0x17   :  { %471 = vmatpush.xpose.msk.msra.mxu2 %vm63_vm0, %v41_v8  ;;  %472 = vmatpush.xpose.msk.msra.mxu3 %vm63_vm0, %v41_v8 }
  0x19   :  { %83 = vadd.xlane.f32.xlu0 %v82_v26 }
  0x1a   :  { %429 = vmatpush.xpose.msk.msra.mxu0 %vm63_vm0, %v40_v13  ;;  %473 = vmatpush.xpose.msk.msra.mxu1 %vm63_vm0, %v40_v13 }
  0x1b   :  { %474 = vmatpush.xpose.msk.msra.mxu2 %vm63_vm0, %v40_v13  ;;  %475 = vmatpush.xpose.msk.msra.mxu3 %vm63_vm0, %v40_v13 }
  0x1c   :  { %86 = vadd.xlane.f32.xlu1 %v85_v35  ;;  %89 = vadd.xlane.f32.xlu2 %v88_v45 }
  0x1e   :  { %430 = vmatpush.xpose.msk.msra.mxu0 %vm63_vm0, %v39_v16  ;;  %476 = vmatpush.xpose.msk.msra.mxu1 %vm63_vm0, %v39_v16 }
  0x1f   :  { %477 = vmatpush.xpose.msk.msra.mxu2 %vm63_vm0, %v39_v16  ;;  %478 = vmatpush.xpose.msk.msra.mxu3 %vm63_vm0, %v39_v16 }
  0x21   :  { %92 = vadd.xlane.f32.xlu0 %v91_v36 }
  0x22   :  { %431 = vmatpush.xpose.msk.msra.mxu0 %vm63_vm0, %v38_v23  ;;  %479 = vmatpush.xpose.msk.msra.mxu1 %vm63_vm0, %v38_v23 }
  0x23   :  { %480 = vmatpush.xpose.msk.msra.mxu2 %vm63_vm0, %v38_v23  ;;  %481 = vmatpush.xpose.msk.msra.mxu3 %vm63_vm0, %v38_v23 }
  0x24   :  { %95 = vadd.xlane.f32.xlu1 %v94_v46  ;;  %98 = vadd.xlane.f32.xlu2 %v97_v54 }
  0x26   :  { %432 = vmatpush.xpose.msk.msra.mxu0 %vm63_vm0, %v37_v30  ;;  %482 = vmatpush.xpose.msk.msra.mxu1 %vm63_vm0, %v37_v30 }
  0x27   :  { %483 = vmatpush.xpose.msk.msra.mxu2 %vm63_vm0, %v37_v30  ;;  %484 = vmatpush.xpose.msk.msra.mxu3 %vm63_vm0, %v37_v30 }
  0x29   :  { %101 = vadd.xlane.f32.xlu0 %v100_v47 }
  0x2a   :  { %433 = vmatpush.xpose.msk.msra.mxu0 %vm63_vm0, %v36_v37  ;;  %485 = vmatpush.xpose.msk.msra.mxu1 %vm63_vm0, %v36_v37 }
  0x2b   :  { %486 = vmatpush.xpose.msk.msra.mxu2 %vm63_vm0, %v36_v37  ;;  %487 = vmatpush.xpose.msk.msra.mxu3 %vm63_vm0, %v36_v37 }
  0x2c   :  { %104 = vadd.xlane.f32.xlu1 %v103_v55  ;;  %107 = vadd.xlane.f32.xlu2 %v106_v63 }
  0x2e   :  { %434 = vmatpush.xpose.msk.msra.mxu0 %vm63_vm0, %v35_v43  ;;  %488 = vmatpush.xpose.msk.msra.mxu1 %vm63_vm0, %v35_v43 }
  0x2f   :  { %489 = vmatpush.xpose.msk.msra.mxu2 %vm63_vm0, %v35_v43  ;;  %490 = vmatpush.xpose.msk.msra.mxu3 %vm63_vm0, %v35_v43 }
  0x31   :  { %110 = vadd.xlane.f32.xlu0 %v109_v62 }
  0x32   :  { %435 = vmatpush.xpose.msk.msra.mxu0 %vm63_vm0, %v34_v48  ;;  %491 = vmatpush.xpose.msk.msra.mxu1 %vm63_vm0, %v34_v48 }
  0x33   :  { %492 = vmatpush.xpose.msk.msra.mxu2 %vm63_vm0, %v34_v48  ;;  %493 = vmatpush.xpose.msk.msra.mxu3 %vm63_vm0, %v34_v48 }
  0x36   :  { %436 = vmatpush.xpose.msk.msra.mxu0 %vm63_vm0, %v33_v52  ;;  %494 = vmatpush.xpose.msk.msra.mxu1 %vm63_vm0, %v33_v52 }
  0x37   :  { %495 = vmatpush.xpose.msk.msra.mxu2 %vm63_vm0, %v33_v52  ;;  %496 = vmatpush.xpose.msk.msra.mxu3 %vm63_vm0, %v33_v52 }
  0x3a   :  { %437 = vmatpush.xpose.msk.msra.mxu0 %vm63_vm0, %v32_v56  ;;  %497 = vmatpush.xpose.msk.msra.mxu1 %vm63_vm0, %v32_v56 }
  0x3b   :  { %498 = vmatpush.xpose.msk.msra.mxu2 %vm63_vm0, %v32_v56  ;;  %499 = vmatpush.xpose.msk.msra.mxu3 %vm63_vm0, %v32_v56 }
  0x3e   :  { %438 = vmatpush.xpose.msk.msra.mxu0 %vm63_vm0, %v31_v61  ;;  %500 = vmatpush.xpose.msk.msra.mxu1 %vm63_vm0, %v31_v61 }
  0x3f   :  { %501 = vmatpush.xpose.msk.msra.mxu2 %vm63_vm0, %v31_v61  ;;  %502 = vmatpush.xpose.msk.msra.mxu3 %vm63_vm0, %v31_v61 }
  0x41   :  { %439 = vmatmul.msk.f32.vlgmr.msra.gmra.mxu0 %vm63_vm0, %v615_v4  ;;  %443 = vmatmul.msk.f32.vlgmr.msra.gmra.mxu1 %vm63_vm0, %v667_v17 }
  0x42   :  { %447 = vmatmul.msk.f32.vlgmr.msra.gmra.mxu2 %vm63_vm0, %v23_v38  ;;  %451 = vmatmul.msk.f32.vlgmr.msra.gmra.mxu3 %vm63_vm0, %v27_v39 }
  0x49   :  { %440 = vmatmul.msk.f32.gmra.mxu0 %vm63_vm0, %v642_v10  ;;  %444 = vmatmul.msk.f32.gmra.mxu1 %vm63_vm0, %v700_v27 }
  0x4a   :  { %448 = vmatmul.msk.f32.gmra.mxu2 %vm63_vm0, %v710_v29  ;;  %452 = vmatmul.msk.f32.gmra.mxu3 %vm63_vm0, %v28_v49 }
  0x51   :  { %441 = vmatmul.msk.f32.gmra.mxu0 %vm63_vm0, %v637_v9  ;;  %445 = vmatmul.msk.f32.gmra.mxu1 %vm63_vm0, %v677_v19 }
  0x52   :  { %449 = vmatmul.msk.f32.gmra.mxu2 %vm63_vm0, %v25_v41  ;;  %453 = vmatmul.msk.f32.gmra.mxu3 %vm63_vm0, %v29_v57 }
  0x59   :  { %442 = vmatmul.msk.f32.gmra.mxu0 %vm63_vm0, %v672_v18  ;;  %446 = vmatmul.msk.f32.gmra.mxu1 %vm63_vm0, %v705_v28 }
  0x5a   :  { %450 = vmatmul.msk.f32.gmra.mxu2 %vm63_vm0, %v26_v50  ;;  %454 = vmatmul.msk.f32.gmra.mxu3 %vm63_vm0, %v30_v58 }
  0x7c   :  { %v66_v0 = vpop.xlane.xlu0 %65 }
  0x7d   :  { %v112_v12 = vmul.f32 -1.0, %v66_v0 }
  0x7f   :  { %v72_v1 = vpop.xlane.xlu1 %71  ;;  %v78_v3 = vpop.xlane.xlu2 %77  ;;  %v293_v17 = vadd.f32 %v834_v11, %v112_v12 }
  0x80   :  { %v116_v13 = vmul.f32 -1.0, %v78_v3  ;;  %v114_v49 = vmul.f32 -1.0, %v72_v1 }
  0x82   :  { %v297_v18 = vadd.f32 %v834_v11, %v116_v13  ;;  %v295_v63 = vadd.f32 %v834_v11, %v114_v49 }
  0x84   :  { %v69_v2 = vpop.xlane.xlu0 %68 }
  0x85   :  { %v113_v25 = vmul.f32 -1.0, %v69_v2 }
  0x87   :  { %v825_v4 = vpop.xlane.xlu1 %74  ;;  %v81_v6 = vpop.xlane.xlu2 %80  ;;  %v294_v37 = vadd.f32 %v834_v11, %v113_v25 }
  0x88   :  { %v117_v27 = vmul.f32 -1.0, %v81_v6 }
  0x8a   :  { %v298_v43 = vadd.f32 %v834_v11, %v117_v27 }
  0x8c   :  { %v84_v5 = vpop.xlane.xlu0 %83 }
  0x8d   :  { %v118_v52 = vmul.f32 -1.0, %v84_v5 }
  0x8f   :  { %v827_v7 = vpop.xlane.xlu1 %86  ;;  %v90_v9 = vpop.xlane.xlu2 %89  ;;  %v299_v5 = vadd.f32 %v834_v11, %v118_v52 }
  0x90   :  { %v120_v21 = vmul.f32 -1.0, %v90_v9  ;;  %v119_v25 = vmul.f32 -1.0, %v827_v7 }
  0x92   :  { %v301_v30 = vadd.f32 %v834_v11, %v120_v21 }
  0x94   :  { %v93_v8 = vpop.xlane.xlu0 %92 }
  0x95   :  { %v121_v38 = vmul.f32 -1.0, %v93_v8 }
  0x97   :  { %v829_v10 = vpop.xlane.xlu1 %95  ;;  %v838_v26 = vpop.xlane.xlu2 %98  ;;  %v302_v57 = vadd.f32 %v834_v11, %v121_v38 }
  0x98   :  { %v123_v52 = vmul.f32 -1.0, %v838_v26 }
  0x9c   :  { %v102_v14 = vpop.xlane.xlu0 %101 }
  0x9d   :  { %v124_v22 = vmul.f32 -1.0, %v102_v14  ;;  %v122_v14 = vmul.f32 -1.0, %v829_v10 }
  0x9f   :  { %v305_v31 = vadd.f32 %v834_v11, %v124_v22  ;;  %v105_v32 = vpop.xlane.xlu1 %104  ;;  %v108_v61 = vpop.xlane.xlu2 %107  ;;  %v115_v22 = vmul.f32 -1.0, %v825_v4  ;;  %v303_v10 = vadd.f32 %v834_v11, %v122_v14 }
  0xa0   :  { %v125_v48 = vmul.f32 -1.0, %v105_v32 }
  0xa2   :  { %v306_v60 = vadd.f32 %v834_v11, %v125_v48 }
  0xbe   :  { %v241_v15 = vpop.f32.mrf.mxu0  ;;  %v253_v16 = vpop.f32.mrf.mxu1 }
  0xbf   :  { %v309_v19 = vmul.f32 2.0, %v241_v15  ;;  %v313_v20 = vmul.f32 2.0, %v253_v16 }
  0xc1   :  { %v325_v23 = vadd.f32 %v309_v19, %v293_v17  ;;  %v329_v24 = vadd.f32 %v313_v20, %v297_v18  ;;  %v126_v19 = vmul.f32 -1.0, %v108_v61 }
  0xc3   :  { %v341_v28 = vmin.f32 %v325_v23, 0.0  ;;  %v345_v29 = vmin.f32 %v329_v24, 0.0  ;;  %v307_v32 = vadd.f32 %v834_v11, %v126_v19 }
  0xc5   :  { %v357_v33 = vmul.f32 1.442695, %v341_v28  ;;  %v365_v34 = vmul.f32 1.442695, %v345_v29  ;;  %v265_v35 = vpop.f32.mrf.mxu2  ;;  %v277_v36 = vpop.f32.mrf.mxu3 }
  0xc6   :  { %v317_v39 = vmul.f32 2.0, %v265_v35  ;;  %v321_v40 = vmul.f32 2.0, %v277_v36  ;;  %v244_v41 = vpop.f32.mrf.mxu0  ;;  %v256_v42 = vpop.f32.mrf.mxu1 }
  0xc7   :  { %507 = vpow2.f32 %v357_v33  ;;  %v310_v44 = vmul.f32 2.0, %v244_v41  ;;  %v314_v45 = vmul.f32 2.0, %v256_v42  ;;  %v111_v33 = vpop.xlane.xlu0 %110 }
  0xc8   :  { %509 = vpow2.f32 %v365_v34  ;;  %v333_v46 = vadd.f32 %v317_v39, %v301_v30  ;;  %v337_v47 = vadd.f32 %v321_v40, %v305_v31  ;;  %v296_v39 = vadd.f32 %v834_v11, %v115_v22 }
  0xc9   :  { %v326_v50 = vadd.f32 %v310_v44, %v294_v37  ;;  %v330_v51 = vadd.f32 %v314_v45, %v298_v43  ;;  %v300_v44 = vadd.f32 %v834_v11, %v119_v25  ;;  %v127_v49 = vmul.f32 -1.0, %v111_v33 }
  0xca   :  { %v349_v53 = vmin.f32 %v333_v46, 0.0  ;;  %v353_v54 = vmin.f32 %v337_v47, 0.0 }
  0xcb   :  { %v342_v55 = vmin.f32 %v326_v50, 0.0  ;;  %v346_v56 = vmin.f32 %v330_v51, 0.0 }
  0xcc   :  { %v373_v58 = vmul.f32 1.442695, %v349_v53  ;;  %v381_v59 = vmul.f32 1.442695, %v353_v54 }
  0xcd   :  { %v508_v62 = vpop.eup %507  ;;  %v359_v0 = vmul.f32 1.442695, %v342_v55  ;;  %v367_v2 = vmul.f32 1.442695, %v346_v56  ;;  %v268_v1 = vpop.f32.mrf.mxu2 }
  0xce   :  { %v280_v3 = vpop.f32.mrf.mxu3  ;;  %v510_v6 = vpop.eup %509  ;;  %389 = vst [vmem:[#allocation2] sm:$0xff] %v508_v62  ;;  %511 = vpow2.f32 %v373_v58  ;;  %v318_v8 = vmul.f32 2.0, %v268_v1 }
  0xcf   :  { %v322_v9 = vmul.f32 2.0, %v280_v3  ;;  %v247_v12 = vpop.f32.mrf.mxu0  ;;  %v259_v13 = vpop.f32.mrf.mxu1  ;;  %393 = vst [vmem:[#allocation2 + $0x20] sm:$0xff] %v510_v6  ;;  %513 = vpow2.f32 %v381_v59  ;;  %v304_v3 = vadd.f32 %v834_v11, %v123_v52 }
  0xd0   :  { %v311_v15 = vmul.f32 2.0, %v247_v12  ;;  %v315_v16 = vmul.f32 2.0, %v259_v13  ;;  %515 = vpow2.f32 %v359_v0  ;;  %v334_v17 = vadd.f32 %v318_v8, %v302_v57 }
  0xd1   :  { %v338_v18 = vadd.f32 %v322_v9, %v306_v60  ;;  %517 = vpow2.f32 %v367_v2  ;;  %v308_v60 = vadd.f32 %v834_v11, %v127_v49 }
  0xd2   :  { %v327_v20 = vadd.f32 %v311_v15, %v295_v63  ;;  %v331_v21 = vadd.f32 %v315_v16, %v299_v5  ;;  %v350_v23 = vmin.f32 %v334_v17, 0.0 }
  0xd3   :  { %v354_v24 = vmin.f32 %v338_v18, 0.0 }
  0xd4   :  { %v343_v27 = vmin.f32 %v327_v20, 0.0  ;;  %v347_v28 = vmin.f32 %v331_v21, 0.0  ;;  %v512_v29 = vpop.eup %511  ;;  %v375_v30 = vmul.f32 1.442695, %v350_v23 }
  0xd5   :  { %v383_v31 = vmul.f32 1.442695, %v354_v24  ;;  %v514_v34 = vpop.eup %513  ;;  %397 = vst [vmem:[#allocation2 + $0x40] sm:$0xff] %v512_v29  ;;  %v271_v37 = vpop.f32.mrf.mxu2 }
  0xd6   :  { %v361_v35 = vmul.f32 1.442695, %v343_v27  ;;  %v369_v36 = vmul.f32 1.442695, %v347_v28  ;;  %v283_v4 = vpop.f32.mrf.mxu3  ;;  %v516_v38 = vpop.eup %515  ;;  %401 = vst [vmem:[#allocation2 + $0x60] sm:$0xff] %v514_v34  ;;  %519 = vpow2.f32 %v375_v30  ;;  %v319_v7 = vmul.f32 2.0, %v271_v37 }
  0xd7   :  { %v323_v40 = vmul.f32 2.0, %v283_v4  ;;  %v250_v41 = vpop.f32.mrf.mxu0  ;;  %v262_v42 = vpop.f32.mrf.mxu1  ;;  %390 = vst [vmem:[#allocation2 + $0x8] sm:$0xff] %v516_v38  ;;  %521 = vpow2.f32 %v383_v31 }
  0xd8   :  { %v518_v43 = vpop.eup %517  ;;  %v312_v45 = vmul.f32 2.0, %v250_v41  ;;  %v316_v46 = vmul.f32 2.0, %v262_v42  ;;  %523 = vpow2.f32 %v361_v35  ;;  %v335_v47 = vadd.f32 %v319_v7, %v303_v10 }
  0xd9   :  { %394 = vst [vmem:[#allocation2 + $0x28] sm:$0xff] %v518_v43  ;;  %v339_v48 = vadd.f32 %v323_v40, %v307_v32  ;;  %525 = vpow2.f32 %v369_v36 }
  0xda   :  { %v328_v50 = vadd.f32 %v312_v45, %v296_v39  ;;  %v332_v51 = vadd.f32 %v316_v46, %v300_v44  ;;  %v351_v53 = vmin.f32 %v335_v47, 0.0 }
  0xdb   :  { %v355_v54 = vmin.f32 %v339_v48, 0.0 }
  0xdc   :  { %v344_v55 = vmin.f32 %v328_v50, 0.0  ;;  %v348_v56 = vmin.f32 %v332_v51, 0.0  ;;  %v520_v57 = vpop.eup %519  ;;  %v377_v58 = vmul.f32 1.442695, %v351_v53 }
  0xdd   :  { %v385_v59 = vmul.f32 1.442695, %v355_v54  ;;  %v522_v61 = vpop.eup %521  ;;  %398 = vst [vmem:[#allocation2 + $0x48] sm:$0xff] %v520_v57  ;;  %v274_v0 = vpop.f32.mrf.mxu2 }
  0xde   :  { %v363_v62 = vmul.f32 1.442695, %v344_v55  ;;  %v371_v63 = vmul.f32 1.442695, %v348_v56  ;;  %v286_v2 = vpop.f32.mrf.mxu3  ;;  %v524_v1 = vpop.eup %523  ;;  %402 = vst [vmem:[#allocation2 + $0x68] sm:$0xff] %v522_v61  ;;  %527 = vpow2.f32 %v377_v58  ;;  %v320_v26 = vmul.f32 2.0, %v274_v0 }
  0xdf   :  { %v324_v6 = vmul.f32 2.0, %v286_v2  ;;  %v526_v5 = vpop.eup %525  ;;  %391 = vst [vmem:[#allocation2 + $0x10] sm:$0xff] %v524_v1  ;;  %529 = vpow2.f32 %v385_v59 }
  0xe0   :  { %395 = vst [vmem:[#allocation2 + $0x30] sm:$0xff] %v526_v5  ;;  %531 = vpow2.f32 %v363_v62  ;;  %v336_v8 = vadd.f32 %v320_v26, %v304_v3 }
  0xe1   :  { %v340_v9 = vadd.f32 %v324_v6, %v308_v60  ;;  %533 = vpow2.f32 %v371_v63 }
  0xe2   :  { %v352_v12 = vmin.f32 %v336_v8, 0.0 }
  0xe3   :  { %v356_v13 = vmin.f32 %v340_v9, 0.0 }
  0xe4   :  { %v528_v14 = vpop.eup %527  ;;  %v379_v15 = vmul.f32 1.442695, %v352_v12 }
  0xe5   :  { %v387_v16 = vmul.f32 1.442695, %v356_v13  ;;  %v530_v17 = vpop.eup %529  ;;  %399 = vst [vmem:[#allocation2 + $0x50] sm:$0xff] %v528_v14 }
  0xe6   :  { %v532_v11 = vpop.eup %531  ;;  %403 = vst [vmem:[#allocation2 + $0x70] sm:$0xff] %v530_v17  ;;  %535 = vpow2.f32 %v379_v15 }
  0xe7   :  { %v534_v18 = vpop.eup %533  ;;  %392 = vst [vmem:[#allocation2 + $0x18] sm:$0xff] %v532_v11  ;;  %537 = vpow2.f32 %v387_v16 }
  0xe8   :  { %396 = vst [vmem:[#allocation2 + $0x38] sm:$0xff] %v534_v18 }
  0xec   :  { %v536_v19 = vpop.eup %535 }
  0xed   :  { %v538_v20 = vpop.eup %537  ;;  %400 = vst [vmem:[#allocation2 + $0x58] sm:$0xff] %v536_v19 }
  0xee   :  { %404 = vst [vmem:[#allocation2 + $0x78] sm:$0xff] %v538_v20 }
  0xef   :  { %417 = dma.vmem_to_hbm [thread:$0]  %s410_s22, 2048, %s412_s25, [#allocation3], %s566_s26, %s566_s26, %s567_s27  }
  0xf0   :  { %563 = dma.done.wait [#allocation3], 2048  }
  0xf1   :  { %564 = vsyncadd [#allocation3], 4294965248 }
  0xf2   :  { %422 = vsyncpa [#allocation3], 1 }

</bundles_post_ra>
